<compile_context>
chip_gen: v7x
topology: tpu7x:2x2x1
jax: 0.10.0
libtpu: 0.0.40
codegen_flags: <defaults>
</compile_context>

<pallas_src>
import functools

import jax
import jax.numpy as jnp
from jax.experimental import pallas as pl
from jax.experimental.pallas import tpu as pltpu


def _actor_kernel(obs_ref, w1_ref, b1_ref, w2_ref, b2_ref, wh_ref, bh_ref,
                  out_ref, *, num_policy, action_dim):
    """One grid step == one B-tile.  All P policies fused into wide matmuls."""
    x = obs_ref[...]                                          # (Bt, obs_dim)

    # layer 1: packed along N -> (Bt, P*H), ReLU
    h = jnp.dot(x, w1_ref[...], preferred_element_type=jnp.float32) + b1_ref[...]
    h = jnp.maximum(h, 0.0)

    # layer 2: block-diagonal -> (Bt, P*F), ReLU
    f = jnp.dot(h, w2_ref[...], preferred_element_type=jnp.float32) + b2_ref[...]
    f = jnp.maximum(f, 0.0)

    # heads: block-diagonal -> (Bt, P*A) logits, policy p at lanes [p*A,(p+1)*A)
    logits = jnp.dot(f, wh_ref[...], preferred_element_type=jnp.float32) + bh_ref[...]

    # per-policy numerically-stable softmax over its own A lanes
    probs_parts = []
    for p in range(num_policy):                                # static unroll
        lg = logits[:, p * action_dim:(p + 1) * action_dim]    # (Bt, A)
        m = jnp.max(lg, axis=-1, keepdims=True)
        e = jnp.exp(lg - m)
        denom = jnp.sum(e, axis=-1, keepdims=True)
        probs_parts.append(e * pl.reciprocal(denom, approx=True))

    # single lane-dense store, already in cat+reshape order
    out_ref[...] = jnp.concatenate(probs_parts, axis=-1).astype(out_ref.dtype)


def pack_params(params):
    """One-time parameter transform: pack policies into the matmul N dim."""
    w1, b1, w2, b2, wh, bh = (params["w1"], params["b1"], params["w2"],
                              params["b2"], params["wh"], params["bh"])
    P, obs_dim, H = w1.shape
    F = w2.shape[-1]
    A = wh.shape[-1]
    return {
        # layer 1: concatenate per-policy weights along N
        "w1p": jnp.transpose(w1, (1, 0, 2)).reshape(obs_dim, P * H),
        "b1p": b1.reshape(1, P * H),
        # layer 2 / heads: block-diagonal so each policy only sees its own slab
        "w2bd": jax.scipy.linalg.block_diag(*[w2[i] for i in range(P)]),
        "b2p": b2.reshape(1, P * F),
        "whbd": jax.scipy.linalg.block_diag(*[wh[i] for i in range(P)]),
        "bhp": bh.reshape(1, P * A),
        "num_policy": int(P),
        "action_dim": int(A),
    }


def marl_ppo_actor_forward(obs, packed):
    """obs: (B, obs_dim) f32. packed: output of pack_params.
    Returns (out, state) with out: (B, num_policy, action_dim), state=None —
    matching MARLPPOActor.forward(obs) with ret_feature=False."""
    w1p, b1p = packed["w1p"], packed["b1p"]
    w2bd, b2p = packed["w2bd"], packed["b2p"]
    whbd, bhp = packed["whbd"], packed["bhp"]
    num_policy, action_dim = packed["num_policy"], packed["action_dim"]

    B, obs_dim = obs.shape
    PH = w1p.shape[1]
    PF = w2bd.shape[1]
    PA = whbd.shape[1]

    # B-tiling: single block for small batches; 256-row tiles (sublane- and
    # megacore-friendly) for large batches, with zero-padding sliced off.
    if B <= 256:
        B_tile, B_pad = B, B
        obs_in = obs
    else:
        B_tile = 256
        B_pad = pl.cdiv(B, B_tile) * B_tile
        obs_in = jnp.pad(obs, ((0, B_pad - B), (0, 0)))

    kernel = functools.partial(_actor_kernel,
                               num_policy=num_policy, action_dim=action_dim)

    grid_spec = pltpu.PrefetchScalarGridSpec(
        num_scalar_prefetch=0,
        grid=(B_pad // B_tile,),
        in_specs=[
            pl.BlockSpec((B_tile, obs_dim), lambda i: (i, 0)),
            # weights / biases: constant block index -> resident across B tiles
            pl.BlockSpec((obs_dim, PH), lambda i: (0, 0)),
            pl.BlockSpec((1, PH), lambda i: (0, 0)),
            pl.BlockSpec((PH, PF), lambda i: (0, 0)),
            pl.BlockSpec((1, PF), lambda i: (0, 0)),
            pl.BlockSpec((PF, PA), lambda i: (0, 0)),
            pl.BlockSpec((1, PA), lambda i: (0, 0)),
        ],
        out_specs=pl.BlockSpec((B_tile, PA), lambda i: (i, 0)),
    )

    out_flat = pl.pallas_call(
        kernel,
        out_shape=jax.ShapeDtypeStruct((B_pad, PA), jnp.float32),
        grid_spec=grid_spec,
        compiler_params=pltpu.CompilerParams(
            dimension_semantics=("parallel",)),
    )(obs_in, w1p, b1p, w2bd, b2p, whbd, bhp)

    if B_pad != B:
        out_flat = out_flat[:B]
    # contiguous reshape only (no transpose): lanes are already ordered
    # [policy0 actions | policy1 actions | ...], matching torch.cat + reshape.
    out = out_flat.reshape(B, num_policy, action_dim)
    return out, None


def init_params(key, num_policy, obs_dim, hidden_dim, feature_dim, action_dim):
    """Deterministic synthetic init (shapes match the PyTorch module)."""
    ks = jax.random.split(key, 6)
    scale = 0.1
    return {
        "w1": scale * jax.random.normal(ks[0], (num_policy, obs_dim, hidden_dim),
                                        jnp.float32),
        "b1": scale * jax.random.normal(ks[1], (num_policy, hidden_dim),
                                        jnp.float32),
        "w2": scale * jax.random.normal(ks[2], (num_policy, hidden_dim,
                                                feature_dim), jnp.float32),
        "b2": scale * jax.random.normal(ks[3], (num_policy, feature_dim),
                                        jnp.float32),
        "wh": scale * jax.random.normal(ks[4], (num_policy, feature_dim,
                                                action_dim), jnp.float32),
        "bh": scale * jax.random.normal(ks[5], (num_policy, action_dim),
                                        jnp.float32),
    }


if __name__ == "__main__":
    # Small shapes consistent with the module's forward.
    B, obs_dim, hidden_dim, feature_dim, action_dim, num_policy = 2, 16, 32, 32, 8, 3

    key = jax.random.PRNGKey(0)
    k_obs, k_par = jax.random.split(key)
    obs = jax.random.normal(k_obs, (B, obs_dim), jnp.float32)
    params = init_params(k_par, num_policy, obs_dim, hidden_dim, feature_dim,
                         action_dim)
    packed = pack_params(params)   # one-time weight packing (not per-call)

    out, state = marl_ppo_actor_forward(obs, packed)
    out = jax.block_until_ready(out)

    # Sanity: softmax rows sum to 1, shape matches (B, num_policy, action_dim).
    # Tolerance relaxed for the approx (EUP) reciprocal in the kernel softmax.
    assert out.shape == (B, num_policy, action_dim)
    assert jnp.allclose(jnp.sum(out, axis=-1), 1.0, atol=2e-3)

    # Pure-JAX reference check (uses the original, unpacked per-policy params).
    def ref_forward(obs, p):
        outs = []
        for i in range(num_policy):
            h = jnp.maximum(obs @ p["w1"][i] + p["b1"][i], 0.0)
            f = jnp.maximum(h @ p["w2"][i] + p["b2"][i], 0.0)
            logits = f @ p["wh"][i] + p["bh"][i]
            outs.append(logits)
        o = jnp.concatenate(outs, axis=-1).reshape(-1, num_policy, action_dim)
        return jax.nn.softmax(o, axis=-1)

    ref = ref_forward(obs, params)
    assert jnp.allclose(out, ref, atol=2e-3), "mismatch vs reference"

    print("KERNEL_OK")
</pallas_src>

<mosaic_0001>
module attributes {stable_mosaic.version = 11 : i64} {
  func.func @_actor_kernel(%arg0: i32, %arg1: memref<2x16xf32, #tpu.memory_space<vmem>>, %arg2: memref<16x96xf32, #tpu.memory_space<vmem>>, %arg3: memref<1x96xf32, #tpu.memory_space<vmem>>, %arg4: memref<96x96xf32, #tpu.memory_space<vmem>>, %arg5: memref<1x96xf32, #tpu.memory_space<vmem>>, %arg6: memref<96x24xf32, #tpu.memory_space<vmem>>, %arg7: memref<1x24xf32, #tpu.memory_space<vmem>>, %arg8: memref<2x24xf32, #tpu.memory_space<vmem>>) attributes {dimension_semantics = [#tpu.dimension_semantics<parallel>], iteration_bounds = array<i64: 1>, scalar_prefetch = 0 : i64, scratch_operands = 0 : i64, tpu.core_type = #tpu.core_type<tc>, window_params = [{transform_indices = @transform_0, window_bounds = array<i64: 2, 16>}, {pipeline_mode = #tpu.pipeline_mode<synchronous>, transform_indices = @transform_1, window_bounds = array<i64: 16, 96>}, {pipeline_mode = #tpu.pipeline_mode<synchronous>, transform_indices = @transform_2, window_bounds = array<i64: 1, 96>}, {pipeline_mode = #tpu.pipeline_mode<synchronous>, transform_indices = @transform_3, window_bounds = array<i64: 96, 96>}, {pipeline_mode = #tpu.pipeline_mode<synchronous>, transform_indices = @transform_4, window_bounds = array<i64: 1, 96>}, {pipeline_mode = #tpu.pipeline_mode<synchronous>, transform_indices = @transform_5, window_bounds = array<i64: 96, 24>}, {pipeline_mode = #tpu.pipeline_mode<synchronous>, transform_indices = @transform_6, window_bounds = array<i64: 1, 24>}, {transform_indices = @transform_7, window_bounds = array<i64: 2, 24>}]} {
    %c0 = arith.constant 0 : index
    %c0_0 = arith.constant 0 : index
    %0 = vector.load %arg1[%c0, %c0_0] : memref<2x16xf32, #tpu.memory_space<vmem>>, vector<2x16xf32>
    %c0_1 = arith.constant 0 : index
    %c0_2 = arith.constant 0 : index
    %1 = vector.load %arg2[%c0_1, %c0_2] : memref<16x96xf32, #tpu.memory_space<vmem>>, vector<16x96xf32>
    %cst = arith.constant dense<0.000000e+00> : vector<2x96xf32>
    %2 = tpu.matmul %0, %1, %cst {dimension_numbers = #tpu.dot_dimension_numbers<[1], [0], [0], [1], [0, 0, 1, 1], [], []>} : vector<2x16xf32>, vector<16x96xf32>, vector<2x96xf32> -> vector<2x96xf32>
    %c0_3 = arith.constant 0 : index
    %c0_4 = arith.constant 0 : index
    %3 = vector.load %arg3[%c0_3, %c0_4] : memref<1x96xf32, #tpu.memory_space<vmem>>, vector<1x96xf32>
    %4 = vector.broadcast %3 : vector<1x96xf32> to vector<2x96xf32>
    %5 = arith.addf %2, %4 : vector<2x96xf32>
    %cst_5 = arith.constant 0.000000e+00 : f32
    %6 = vector.broadcast %cst_5 : f32 to vector<2x96xf32>
    %7 = arith.maximumf %5, %6 : vector<2x96xf32>
    %c0_6 = arith.constant 0 : index
    %c0_7 = arith.constant 0 : index
    %8 = vector.load %arg4[%c0_6, %c0_7] : memref<96x96xf32, #tpu.memory_space<vmem>>, vector<96x96xf32>
    %cst_8 = arith.constant dense<0.000000e+00> : vector<2x96xf32>
    %9 = tpu.matmul %7, %8, %cst_8 {dimension_numbers = #tpu.dot_dimension_numbers<[1], [0], [0], [1], [0, 0, 1, 1], [], []>} : vector<2x96xf32>, vector<96x96xf32>, vector<2x96xf32> -> vector<2x96xf32>
    %c0_9 = arith.constant 0 : index
    %c0_10 = arith.constant 0 : index
    %10 = vector.load %arg5[%c0_9, %c0_10] : memref<1x96xf32, #tpu.memory_space<vmem>>, vector<1x96xf32>
    %11 = vector.broadcast %10 : vector<1x96xf32> to vector<2x96xf32>
    %12 = arith.addf %9, %11 : vector<2x96xf32>
    %cst_11 = arith.constant 0.000000e+00 : f32
    %13 = vector.broadcast %cst_11 : f32 to vector<2x96xf32>
    %14 = arith.maximumf %12, %13 : vector<2x96xf32>
    %c0_12 = arith.constant 0 : index
    %c0_13 = arith.constant 0 : index
    %15 = vector.load %arg6[%c0_12, %c0_13] : memref<96x24xf32, #tpu.memory_space<vmem>>, vector<96x24xf32>
    %cst_14 = arith.constant dense<0.000000e+00> : vector<2x24xf32>
    %16 = tpu.matmul %14, %15, %cst_14 {dimension_numbers = #tpu.dot_dimension_numbers<[1], [0], [0], [1], [0, 0, 1, 1], [], []>} : vector<2x96xf32>, vector<96x24xf32>, vector<2x24xf32> -> vector<2x24xf32>
    %c0_15 = arith.constant 0 : index
    %c0_16 = arith.constant 0 : index
    %17 = vector.load %arg7[%c0_15, %c0_16] : memref<1x24xf32, #tpu.memory_space<vmem>>, vector<1x24xf32>
    %18 = vector.broadcast %17 : vector<1x24xf32> to vector<2x24xf32>
    %19 = arith.addf %16, %18 : vector<2x24xf32>
    %20 = vector.extract_strided_slice %19 {offsets = [0, 0], sizes = [2, 8], strides = [1, 1]} : vector<2x24xf32> to vector<2x8xf32>
    %cst_17 = arith.constant dense<0xFF800000> : vector<2xf32>
    %21 = vector.multi_reduction <maximumf>, %20, %cst_17 [1] : vector<2x8xf32> to vector<2xf32>
    %22 = vector.shape_cast %21 : vector<2xf32> to vector<2x1xf32>
    %23 = vector.broadcast %22 : vector<2x1xf32> to vector<2x8xf32>
    %24 = arith.subf %20, %23 : vector<2x8xf32>
    %25 = math.exp %24 : vector<2x8xf32>
    %cst_18 = arith.constant dense<0.000000e+00> : vector<2xf32>
    %26 = vector.multi_reduction <add>, %25, %cst_18 [1] : vector<2x8xf32> to vector<2xf32>
    %27 = vector.shape_cast %26 : vector<2xf32> to vector<2x1xf32>
    %28 = tpu.reciprocal %27 {approx = true} : vector<2x1xf32> -> vector<2x1xf32>
    %29 = vector.broadcast %28 : vector<2x1xf32> to vector<2x8xf32>
    %30 = arith.mulf %25, %29 : vector<2x8xf32>
    %31 = vector.extract_strided_slice %19 {offsets = [0, 8], sizes = [2, 8], strides = [1, 1]} : vector<2x24xf32> to vector<2x8xf32>
    %cst_19 = arith.constant dense<0xFF800000> : vector<2xf32>
    %32 = vector.multi_reduction <maximumf>, %31, %cst_19 [1] : vector<2x8xf32> to vector<2xf32>
    %33 = vector.shape_cast %32 : vector<2xf32> to vector<2x1xf32>
    %34 = vector.broadcast %33 : vector<2x1xf32> to vector<2x8xf32>
    %35 = arith.subf %31, %34 : vector<2x8xf32>
    %36 = math.exp %35 : vector<2x8xf32>
    %cst_20 = arith.constant dense<0.000000e+00> : vector<2xf32>
    %37 = vector.multi_reduction <add>, %36, %cst_20 [1] : vector<2x8xf32> to vector<2xf32>
    %38 = vector.shape_cast %37 : vector<2xf32> to vector<2x1xf32>
    %39 = tpu.reciprocal %38 {approx = true} : vector<2x1xf32> -> vector<2x1xf32>
    %40 = vector.broadcast %39 : vector<2x1xf32> to vector<2x8xf32>
    %41 = arith.mulf %36, %40 : vector<2x8xf32>
    %42 = vector.extract_strided_slice %19 {offsets = [0, 16], sizes = [2, 8], strides = [1, 1]} : vector<2x24xf32> to vector<2x8xf32>
    %cst_21 = arith.constant dense<0xFF800000> : vector<2xf32>
    %43 = vector.multi_reduction <maximumf>, %42, %cst_21 [1] : vector<2x8xf32> to vector<2xf32>
    %44 = vector.shape_cast %43 : vector<2xf32> to vector<2x1xf32>
    %45 = vector.broadcast %44 : vector<2x1xf32> to vector<2x8xf32>
    %46 = arith.subf %42, %45 : vector<2x8xf32>
    %47 = math.exp %46 : vector<2x8xf32>
    %cst_22 = arith.constant dense<0.000000e+00> : vector<2xf32>
    %48 = vector.multi_reduction <add>, %47, %cst_22 [1] : vector<2x8xf32> to vector<2xf32>
    %49 = vector.shape_cast %48 : vector<2xf32> to vector<2x1xf32>
    %50 = tpu.reciprocal %49 {approx = true} : vector<2x1xf32> -> vector<2x1xf32>
    %51 = vector.broadcast %50 : vector<2x1xf32> to vector<2x8xf32>
    %52 = arith.mulf %47, %51 : vector<2x8xf32>
    %53 = tpu.concatenate %30, %41, %52 in 1 : vector<2x8xf32>, vector<2x8xf32>, vector<2x8xf32> -> vector<2x24xf32>
    %c0_23 = arith.constant 0 : index
    %c0_24 = arith.constant 0 : index
    %54 = vector.load %arg8[%c0_23, %c0_24] : memref<2x24xf32, #tpu.memory_space<vmem>>, vector<2x24xf32>
    tpu.vector_store %arg8[%c0_23, %c0_24], %53 {strides = array<i32>} : memref<2x24xf32, #tpu.memory_space<vmem>>, vector<2x24xf32>,
    return
  }
  func.func @transform_0(%arg0: i32) -> (i32, i32) {
    %c0_i32 = arith.constant 0 : i32
    %c0_i32_0 = arith.constant 0 : i32
    return %arg0, %c0_i32 : i32, i32
  }
  func.func @transform_1(%arg0: i32) -> (i32, i32) {
    %c0_i32 = arith.constant 0 : i32
    %c0_i32_0 = arith.constant 0 : i32
    %c0_i32_1 = arith.constant 0 : i32
    return %c0_i32, %c0_i32_0 : i32, i32
  }
  func.func @transform_2(%arg0: i32) -> (i32, i32) {
    %c0_i32 = arith.constant 0 : i32
    %c0_i32_0 = arith.constant 0 : i32
    %c0_i32_1 = arith.constant 0 : i32
    return %c0_i32, %c0_i32_0 : i32, i32
  }
  func.func @transform_3(%arg0: i32) -> (i32, i32) {
    %c0_i32 = arith.constant 0 : i32
    %c0_i32_0 = arith.constant 0 : i32
    %c0_i32_1 = arith.constant 0 : i32
    return %c0_i32, %c0_i32_0 : i32, i32
  }
  func.func @transform_4(%arg0: i32) -> (i32, i32) {
    %c0_i32 = arith.constant 0 : i32
    %c0_i32_0 = arith.constant 0 : i32
    %c0_i32_1 = arith.constant 0 : i32
    return %c0_i32, %c0_i32_0 : i32, i32
  }
  func.func @transform_5(%arg0: i32) -> (i32, i32) {
    %c0_i32 = arith.constant 0 : i32
    %c0_i32_0 = arith.constant 0 : i32
    %c0_i32_1 = arith.constant 0 : i32
    return %c0_i32, %c0_i32_0 : i32, i32
  }
  func.func @transform_6(%arg0: i32) -> (i32, i32) {
    %c0_i32 = arith.constant 0 : i32
    %c0_i32_0 = arith.constant 0 : i32
    %c0_i32_1 = arith.constant 0 : i32
    return %c0_i32, %c0_i32_0 : i32, i32
  }
  func.func @transform_7(%arg0: i32) -> (i32, i32) {
    %c0_i32 = arith.constant 0 : i32
    %c0_i32_0 = arith.constant 0 : i32
    return %arg0, %c0_i32 : i32, i32
  }
}

</mosaic_0001>

<bundles_post_ra>
// kernel: tpu_custom_call.1
= control target key start
LH: loop header
LB: loop body
LE: loop exit
PB: predicated region body
PF: predicated region fallthrough
CT: control target
= control target key end

     0   :  { %v538_v2 = vmov 0.0|0.0   ;;  %vm539_vm0 = vmmov 0   ;;  %v540_v4 = vmov 0.0   ;;  %vm37_vm1 = vcmask 130048   ;;  %s708_s0 = inlined_call_operand.vmem [shape: f32[2,16], index: 0, kind: input, shape index: {}]   ;;  %s709_s1 = inlined_call_operand.vmem [shape: f32[16,96], index: 1, kind: input, shape index: {}]   ;;  %s710_s2 = inlined_call_operand.vmem [shape: f32[1,96], index: 2, kind: input, shape index: {}]   ;;  %s711_s3 = inlined_call_operand.vmem [shape: f32[96,96], index: 3, kind: input, shape index: {}]   ;;  %s712_s4 = inlined_call_operand.vmem [shape: f32[1,96], index: 4, kind: input, shape index: {}]   ;;  %s713_s5 = inlined_call_operand.vmem [shape: f32[96,24], index: 5, kind: input, shape index: {}]   ;;  %s714_s6 = inlined_call_operand.vmem [shape: f32[1,24], index: 6, kind: input, shape index: {}]   ;;  %s715_s7 = inlined_call_operand.hbm [shape: f32[2,24], index: 7, kind: output, shape index: {}]  }
   0x1   :  { %v28_v0 = vld [vmem:[%s709_s1] sm:$0xff]  ;;  %v29_v1 = vld [vmem:[%s709_s1 + $0x8] sm:$0xff]  ;;  %457 = vmatprep.subr.bf16.mxu0 %v538_v2  ;;  %400 = vmatprep.mubr.msk.f32.mxu0 %vm539_vm0, %v540_v4  ;;  %v114_v8 = vld [vmem:[%s711_s3 + $0x10] sm:$0xff] }
   0x2   :  { %v458_v3 = vpack.c.bf16 %v29_v1, %v28_v0  ;;  %v112_v5 = vld [vmem:[%s711_s3] sm:$0xff]  ;;  %v113_v6 = vld [vmem:[%s711_s3 + $0x8] sm:$0xff]  ;;  %460 = vmatprep.subr.bf16.mxu1 %v538_v2  ;;  %v115_v9 = vld [vmem:[%s711_s3 + $0x18] sm:$0xff]  ;;  %427 = vmatprep.mubr.msk.f32.mxu1 %vm539_vm0, %v540_v4 }
   0x3   :  { %v461_v7 = vpack.c.bf16 %v113_v6, %v112_v5  ;;  %v27_v10 = vld [vmem:[%s708_s0] sm:$0x3]  ;;  %v464_v11 = vpack.c.bf16 %v115_v9, %v114_v8  ;;  %v117_v13 = vld [vmem:[%s711_s3 + $0x28] sm:$0xff] }
   0x4   :  { %459 = vmatpush3.bf16.msra.mxu0 %v458_v3  ;;  %v116_v12 = vld [vmem:[%s711_s3 + $0x20] sm:$0xff] }
   0x5   :  { %462 = vmatpush3.bf16.msra.mxu1 %v461_v7  ;;  %478 = vmatprep.subr.bf16.mxu0 %v538_v2 }
   0x6   :  { %463 = vmatprep.subr.bf16.mxu1 %v538_v2 }
   0x7   :  { %12 = vsyncpa [#allocation3], 0  ;;  %401 = vmatmul.mubr.msk.f32.vlgmr.msra.gmra.mrb[0].mxu0 %vm37_vm1, %v27_v10  ;;  %v467_v14 = vpack.c.bf16 %v117_v13, %v116_v12  ;;  %v118_v15 = vld [vmem:[%s711_s3 + $0x30] sm:$0xff]  ;;  %v119_v16 = vld [vmem:[%s711_s3 + $0x38] sm:$0xff]  ;;  %vm131_vm2 = vcmask 785408   ;;  %vm310_vm3 = vcmask 123968  }
   0x8   :  { %454 = vmatprep.mubr.msk.f32.mxu0 %vm539_vm0, %v540_v4  ;;  %v470_v17 = vpack.c.bf16 %v119_v16, %v118_v15  ;;  %v120_v18 = vld [vmem:[%s711_s3 + $0x40] sm:$0xff]  ;;  %v121_v19 = vld [vmem:[%s711_s3 + $0x48] sm:$0xff]  ;;  %v122_v21 = vld [vmem:[%s711_s3 + $0x50] sm:$0xff]  ;;  %vm298_vm4 = vcmask 58368   ;;  %vm326_vm5 = vcmask 189568   ;;  %vm342_vm6 = vcmask 64512  }
   0x9   :  { %465 = vmatpush3.bf16.msra.mxu1 %v464_v11  ;;  %v473_v20 = vpack.c.bf16 %v121_v19, %v120_v18  ;;  %v123_v22 = vld [vmem:[%s711_s3 + $0x58] sm:$0xff]  ;;  %v206_v24 = vld [vmem:[%s713_s5] sm:$0xff]  ;;  %v207_v25 = vld [vmem:[%s713_s5 + $0x8] sm:$0xff]  ;;  %vm345_vm7 = vcmask 189440  }
   0xa   :  { %466 = vmatprep.subr.bf16.mxu1 %v538_v2  ;;  %v476_v23 = vpack.c.bf16 %v123_v22, %v122_v21  ;;  %v208_v26 = vld [vmem:[%s713_s5 + $0x10] sm:$0xff]  ;;  %v479_v27 = vpack.c.bf16 %v207_v25, %v206_v24  ;;  %v209_v28 = vld [vmem:[%s713_s5 + $0x18] sm:$0xff]  ;;  %v210_v30 = vld [vmem:[%s713_s5 + $0x20] sm:$0xff] }
   0xb   :  { %v482_v29 = vpack.c.bf16 %v209_v28, %v208_v26  ;;  %v211_v31 = vld [vmem:[%s713_s5 + $0x28] sm:$0xff]  ;;  %v212_v33 = vld [vmem:[%s713_s5 + $0x30] sm:$0xff]  ;;  %v213_v34 = vld [vmem:[%s713_s5 + $0x38] sm:$0xff] }
   0xc   :  { %480 = vmatpush3.bf16.msra.mxu0 %v479_v27  ;;  %v485_v32 = vpack.c.bf16 %v211_v31, %v210_v30  ;;  %v488_v35 = vpack.c.bf16 %v213_v34, %v212_v33  ;;  %v214_v36 = vld [vmem:[%s713_s5 + $0x40] sm:$0xff]  ;;  %v215_v37 = vld [vmem:[%s713_s5 + $0x48] sm:$0xff]  ;;  %v216_v44 = vld [vmem:[%s713_s5 + $0x50] sm:$0xff] }
   0xd   :  { %468 = vmatpush3.bf16.msra.mxu1 %v467_v14  ;;  %481 = vmatprep.subr.bf16.mxu0 %v538_v2  ;;  %v491_v38 = vpack.c.bf16 %v215_v37, %v214_v36  ;;  %v361_v39 = vld [vmem:[%s710_s2] ss:$0 sm:$0xff]  ;;  %v217_v45 = vld [vmem:[%s713_s5 + $0x58] sm:$0xff]  ;;  %s542_s5 = smov 112  }
   0xe   :  { %469 = vmatprep.subr.bf16.mxu1 %v538_v2  ;;  %v494_v46 = vpack.c.bf16 %v217_v45, %v216_v44  ;;  %v363_v47 = vld [vmem:[%s712_s4] ss:$0 sm:$0xff]  ;;  %s541_s4 = smov 120  }
   0xf   :  { %v365_v52 = vld [vmem:[%s714_s6] ss:$0 sm:$0xff]  ;;  %s543_s6 = smov [#allocation2]  }
  0x10   :  { %483 = vmatpush3.bf16.msra.mxu0 %v482_v29  ;;  %s353_s1 = sshll.u32 %s543_s6, 4  ;;  %s354_s1 = int_to_ptr.vmem [resolvable:$true] %s353_s1 }
  0x11   :  { %471 = vmatpush3.bf16.msra.mxu1 %v470_v17  ;;  %484 = vmatprep.subr.bf16.mxu0 %v538_v2  ;;  %s514_s9 = scalar_lea.vmem %s354_s1, 32  ;;  %p519_p1 = scmp.lt.s32.totalorder %s354_s1, %s354_s1 }
  0x12   :  { %472 = vmatprep.subr.bf16.mxu1 %v538_v2  ;;  %p515_p0 = scmp.ne.s32.totalorder %s354_s1, %s514_s9  ;;  %p520_p2 = scmp.lt.s32.totalorder %s514_s9, %s514_s9 }
  0x14   :  { %486 = vmatpush3.bf16.msra.mxu0 %v485_v32  ;;  %p521_p3 = por %p520_p2, %p519_p1 }
  0x15   :  { %474 = vmatpush3.bf16.msra.mxu1 %v473_v20  ;;  %487 = vmatprep.subr.bf16.mxu0 %v538_v2 }
  0x16   :  { %475 = vmatprep.subr.bf16.mxu1 %v538_v2  ;;  %p522_p4 = pnand %p521_p3, %p515_p0 }
  0x18   :  { %489 = vmatpush3.bf16.msra.mxu0 %v488_v35 }
  0x19   :  { %477 = vmatpush3.bf16.msra.mxu1 %v476_v23  ;;  %490 = vmatprep.subr.bf16.mxu0 %v538_v2 }
  0x1c   :  { %492 = vmatpush3.bf16.msra.mxu0 %v491_v38 }
  0x1d   :  { %493 = vmatprep.subr.bf16.mxu0 %v538_v2 }
  0x20   :  { %495 = vmatpush3.bf16.msra.mxu0 %v494_v46 }
  0xda   :  { %v107_v40 = vpop.f32.mrb[0].mxu0 }
  0xdb   :  { %v108_v41 = vadd.f32 %v361_v39, %v107_v40  ;;  %v402_v42 = vpop.f32.mrb[1].mxu0 }
  0xdd   :  { %v111_v43 = vmax.f32 %v108_v41, 0.0 }
  0xdf   :  { %428 = vmatmul.mubr.msk.f32.vlgmr.msra.gmra.mrb[0].mxu1 %vm131_vm2, %v111_v43 }
 0x1b2   :  { %v201_v48 = vpop.f32.mrb[0].mxu1 }
 0x1b3   :  { %v202_v49 = vadd.f32 %v363_v47, %v201_v48  ;;  %v429_v50 = vpop.f32.mrb[1].mxu1 }
 0x1b5   :  { %v205_v51 = vmax.f32 %v202_v49, 0.0 }
 0x1b7   :  { %455 = vmatmul.mubr.msk.f32.vlgmr.msra.gmra.mrb[2].mxu0 %vm131_vm2, %v205_v51 }
 0x28a   :  { %v294_v53 = vpop.f32.mrb[2].mxu0 }
 0x28b   :  { %v295_v54 = vadd.f32 %v365_v52, %v294_v53  ;;  %v456_v55 = vpop.f32.mrb[3].mxu0 }
 0x28d   :  { %v311_v56 = vsel %vm310_vm3, %v295_v54, -inf  ;;  %v299_v57 = vsel %vm298_vm4, %v295_v54, -inf  ;;  %v327_v58 = vsel %vm326_vm5, %v295_v54, -inf }
 0x28e   :  { %312 = vmax.xlane.f32.xlu0 %v311_v56  ;;  %300 = vmax.xlane.f32.xlu1 %v299_v57 }
 0x292   :  { %328 = vmax.xlane.f32.xlu0 %v327_v58 }
 0x31b   :  { %v313_v59 = vpop.xlane.xlu0 %312  ;;  %v301_v3 = vpop.xlane.xlu1 %300 }
 0x31c   :  { %v314_v60 = vsub.f32 %v295_v54, %v313_v59  ;;  %v302_v4 = vsub.f32 %v295_v54, %v301_v3 }
 0x31e   :  { %v315_v61 = vmul.f32 1.442695, %v314_v60  ;;  %v303_v5 = vmul.f32 1.442695, %v302_v4 }
 0x31f   :  { %v329_v62 = vpop.xlane.xlu0 %328 }
 0x320   :  { %502 = vpow2.f32 %v315_v61  ;;  %v330_v63 = vsub.f32 %v295_v54, %v329_v62 }
 0x322   :  { %v331_v0 = vmul.f32 1.442695, %v330_v63 }
 0x324   :  { %504 = vpow2.f32 %v331_v0 }
 0x325   :  { %506 = vpow2.f32 %v303_v5 }
 0x32a   :  { %v503_v1 = vpop.eup %502 }
 0x32b   :  { %318 = vrot.lane.b32.xlu1 %v503_v1, %s541_s4 }
 0x32e   :  { %v505_v2 = vpop.eup %504 }
 0x32f   :  { %334 = vrot.lane.b32.xlu0 %v505_v2, %s542_s5  ;;  %v507_v6 = vpop.eup %506 }
 0x330   :  { %v305_v7 = vsel %vm298_vm4, %v507_v6, 0.0 }
 0x34f   :  { %306 = vadd.xlane.f32.xlu1 %v305_v7 }
 0x39d   :  { %v319_v8 = vpop.permute.xlu1 %318 }
 0x39e   :  { %v321_v9 = vsel %vm298_vm4, %v319_v8, 0.0 }
 0x39f   :  { %322 = vadd.xlane.f32.xlu0 %v321_v9 }
 0x3a1   :  { %v335_v10 = vpop.permute.xlu0 %334 }
 0x3a2   :  { %v337_v11 = vsel %vm298_vm4, %v335_v10, 0.0 }
 0x3a3   :  { %338 = vadd.xlane.f32.xlu1 %v337_v11 }
 0x3dc   :  { %v307_v12 = vpop.xlane.xlu1 %306 }
 0x42c   :  { %v323_v13 = vpop.xlane.xlu0 %322 }
 0x42d   :  { %508 = vrcp.f32 %v323_v13 }
 0x42e   :  { %510 = vrcp.f32 %v307_v12 }
 0x430   :  { %v339_v14 = vpop.xlane.xlu1 %338 }
 0x431   :  { %512 = vrcp.f32 %v339_v14 }
 0x437   :  { %v509_v15 = vpop.eup %508 }
 0x438   :  { %v511_v16 = vpop.eup %510  ;;  %v325_v17 = vmul.f32 %v509_v15, %v503_v1 }
 0x439   :  { %v309_v19 = vmul.f32 %v511_v16, %v507_v6 }
 0x43b   :  { %v513_v18 = vpop.eup %512  ;;  %v343_v21 = vsel %vm342_vm6, %v309_v19, %v325_v17 }
 0x43c   :  { %v341_v20 = vmul.f32 %v513_v18, %v505_v2 }
 0x43e   :  { %v344_v22 = vsel %vm37_vm1, %v343_v21, %v341_v20 }
 0x43f   :  { %346 = vst.msk [vmem:[#allocation2] sm:$0x3] %vm345_vm7, %v344_v22 }
 0x440   :  { %525 = shalt.err (!%p522_p4)
}
 0x441   :  { %s526_s12 = scalar_lea.hbm %s715_s7, 32 }
 0x442   :  { %p527_p5 = scmp.ne.s32.totalorder %s715_s7, %s526_s12  ;;  %p530_p6 = scmp.lt.u32.totalorder %s526_s12, %s715_s7 }
 0x444   :  { %p532_p7 = pnand %p530_p6, %p527_p5 }
 0x446   :  { %535 = shalt.err (!%p532_p7)
}
 0x447   :  { %356 = dma.vmem_to_hbm [thread:$0]  %s354_s1, 32, %s715_s7, [#allocation3]  }
 0x448   :  { %536 = dma.done.wait [#allocation3], 32  }
 0x449   :  { %537 = vsyncadd [#allocation3], 4294967264 }
 0x44a   :  { %360 = vsyncpa [#allocation3], 1 }

</bundles_post_ra>
